<compile_context>
chip_gen: v5e
topology: v5e:2x2
jax: 0.10.0
libtpu: 0.0.40
codegen_flags: <defaults>
</compile_context>

<pallas_src>
import functools
import math

import jax
import jax.numpy as jnp
from jax.experimental import pallas as pl
from jax.experimental.pallas import tpu as pltpu


def _round_up(v, m):
    return ((v + m - 1) // m) * m


def _pick_k_tile(k_padded, tk_request):
    """Largest multiple of 128 that divides k_padded and is <= tk_request (trace-time only)."""
    m = k_padded // 128
    want = max(1, min(m, max(1, int(tk_request) // 128)))
    for d in range(want, 0, -1):
        if m % d == 0:
            return 128 * d
    return 128


def _linear_kernel(x_ref, w_ref, b_ref, o_ref, *, true_k, tile_k, needs_mask):
    """One K-chunk of y = x @ W^T + b, accumulated straight into the resident output block."""
    k = pl.program_id(0)

    @pl.when(k == 0)
    def _():
        # Fused bias: initialise the k-invariant (VMEM-resident) output block.
        o_ref[...] = jnp.broadcast_to(b_ref[...], o_ref.shape).astype(o_ref.dtype)

    x = x_ref[...]
    if x.dtype != w_ref.dtype:
        # e.g. bf16-stored weights, f32 activations: cast the small x tile in-kernel.
        x = x.astype(w_ref.dtype)
    if needs_mask:
        # Zero the ragged K tail (x's true K is not a multiple of the tile).
        col = k * tile_k + jax.lax.broadcasted_iota(jnp.int32, x.shape, 1)
        x = jnp.where(col < true_k, x, jnp.zeros_like(x))

    # x:(M, tk) contracted with W:(N, tk) over their last axes  ==  x @ W^T.
    o_ref[...] += jax.lax.dot_general(
        x, w_ref[...], (((1,), (1,)), ((), ())),
        preferred_element_type=jnp.float32,
    )


def simple_projector(x, w, b, *, tk=32768):
    """Forward pass of SimpleProjector: y = x @ w[:, :K].T + b.

    `w` is the nn.Linear weight (output_dim, padded_input_dim), zero-padded along K to a
    multiple of 128 at init (see init_linear_params); `b` is (1, output_dim) float32.
    """
    M, K = x.shape
    N, Kw = w.shape
    assert Kw % 128 == 0 and Kw >= K, "pad the weight's K to a multiple of 128 at init"
    assert b.shape == (1, N)

    tk_eff = _pick_k_tile(Kw, tk)
    steps = Kw // tk_eff

    kernel = functools.partial(
        _linear_kernel, true_k=K, tile_k=tk_eff, needs_mask=(Kw != K))

    # Real VMEM footprint (+ headroom): double-buffered x / w blocks + tiny bias / output.
    def _blk_bytes(rows, cols, dtype):
        itemsize = jnp.dtype(dtype).itemsize
        sub = 8 * max(1, 4 // itemsize)            # sublane granule per dtype
        return _round_up(rows, sub) * _round_up(cols, 128) * itemsize

    vmem_limit = int(
        2 * (_blk_bytes(M, tk_eff, x.dtype) + _blk_bytes(N, tk_eff, w.dtype))
        + 4 * _blk_bytes(M, 128, jnp.float32)
        + (4 << 20)
    )

    y = pl.pallas_call(
        kernel,
        out_shape=jax.ShapeDtypeStruct((M, N), jnp.float32),
        grid_spec=pltpu.PrefetchScalarGridSpec(
            num_scalar_prefetch=0,
            grid=(steps,),
            in_specs=[
                pl.BlockSpec((M, tk_eff), lambda k: (0, k)),   # x K-chunk (lane-dense)
                pl.BlockSpec((N, tk_eff), lambda k: (0, k)),   # W K-chunk (lane-dense)
                pl.BlockSpec((1, N), lambda k: (0, 0)),        # bias (tiny, resident)
            ],
            out_specs=pl.BlockSpec((M, N), lambda k: (0, 0)),  # resident accumulator
        ),
        compiler_params=pltpu.CompilerParams(
            dimension_semantics=("arbitrary",),                # K is a reduction axis
            vmem_limit_bytes=vmem_limit,
        ),
    )(x, w, b)

    return y if x.dtype == jnp.float32 else y.astype(x.dtype)


def init_linear_params(key, input_dim=65450, output_dim=10, weight_dtype=jnp.float32):
    """nn.Linear-style init, pre-packed for the kernel (all static per-call work hoisted here).

    Returns:
      w: (output_dim, round_up(input_dim, 128)) weight, zero-padded along K, in weight_dtype
         (bf16 halves the dominant weight HBM stream; accumulation stays f32 on the MXU).
      b: (1, output_dim) float32 bias.
    """
    k_w, k_b = jax.random.split(key)
    bound = 1.0 / math.sqrt(input_dim)
    w = jax.random.uniform(k_w, (output_dim, input_dim), jnp.float32, -bound, bound)
    b = jax.random.uniform(k_b, (output_dim,), jnp.float32, -bound, bound)
    k_pad = _round_up(input_dim, 128)
    w = jnp.pad(w, ((0, 0), (0, k_pad - input_dim))).astype(weight_dtype)
    return w, b.reshape(1, output_dim)


if __name__ == "__main__":
    key = jax.random.PRNGKey(0)
    k_x, k_p, k_x2, k_p2 = jax.random.split(key, 4)
    hi = jax.lax.Precision.HIGHEST   # high-precision references

    # --- small smoke test: K deliberately NOT a multiple of 128 (exercises the K-tail mask) ---
    batch, input_dim, output_dim = 8, 300, 10
    x = jax.random.normal(k_x, (batch, input_dim), jnp.float32)
    w, b = init_linear_params(k_p, input_dim, output_dim)
    y = jax.block_until_ready(simple_projector(x, w, b))
    y_ref = jnp.dot(x, w[:, :input_dim].T, precision=hi) + b
    assert y.shape == (batch, output_dim)
    assert jnp.allclose(y, y_ref, atol=5e-3, rtol=5e-3), "mismatch (small, f32)"

    # --- bf16-stored weights (halved weight HBM stream), f32 MXU accumulation ---
    w_bf, b_bf = init_linear_params(k_p, input_dim, output_dim, weight_dtype=jnp.bfloat16)
    y_bf = jax.block_until_ready(simple_projector(x, w_bf, b_bf))
    y_bf_ref = jnp.dot(x.astype(jnp.bfloat16).astype(jnp.float32),
                       w_bf[:, :input_dim].astype(jnp.float32).T, precision=hi) + b_bf
    assert jnp.allclose(y_bf, y_bf_ref, atol=3e-2, rtol=3e-2), "mismatch (small, bf16)"

    # --- module-default input_dim=65450: 2 grid steps of tk=32768, masked ragged tail ---
    batch2, input_dim2 = 4, 65450
    x2 = jax.random.normal(k_x2, (batch2, input_dim2), jnp.float32)
    w2, b2 = init_linear_params(k_p2, input_dim2, output_dim)
    y2 = jax.block_until_ready(simple_projector(x2, w2, b2))
    y2_ref = jnp.dot(x2, w2[:, :input_dim2].T, precision=hi) + b2
    assert y2.shape == (batch2, output_dim)
    assert jnp.allclose(y2, y2_ref, atol=2e-2, rtol=2e-2), "mismatch (module default)"

    print("KERNEL_OK")
</pallas_src>

<mosaic_0001>
module attributes {stable_mosaic.version = 11 : i64} {
  func.func @_linear_kernel(%arg0: i32, %arg1: memref<8x384xf32, #tpu.memory_space<vmem>>, %arg2: memref<10x384xf32, #tpu.memory_space<vmem>>, %arg3: memref<1x10xf32, #tpu.memory_space<vmem>>, %arg4: memref<8x10xf32, #tpu.memory_space<vmem>>) attributes {dimension_semantics = [#tpu.dimension_semantics<arbitrary>], iteration_bounds = array<i64: 1>, scalar_prefetch = 0 : i64, scratch_operands = 0 : i64, tpu.core_type = #tpu.core_type<tc>, window_params = [{transform_indices = @transform_0, window_bounds = array<i64: 8, 384>}, {transform_indices = @transform_1, window_bounds = array<i64: 10, 384>}, {pipeline_mode = #tpu.pipeline_mode<synchronous>, transform_indices = @transform_2, window_bounds = array<i64: 1, 10>}, {pipeline_mode = #tpu.pipeline_mode<synchronous>, transform_indices = @transform_3, window_bounds = array<i64: 8, 10>}]} {
    %c0_i32 = arith.constant 0 : i32
    %0 = arith.cmpi eq, %arg0, %c0_i32 : i32
    %1 = arith.extui %0 : i1 to i32
    %c0_i32_0 = arith.constant 0 : i32
    %2 = arith.cmpi ne, %1, %c0_i32_0 : i32
    scf.if %2 {
      %c0_9 = arith.constant 0 : index
      %c0_10 = arith.constant 0 : index
      %17 = vector.load %arg3[%c0_9, %c0_10] : memref<1x10xf32, #tpu.memory_space<vmem>>, vector<1x10xf32>
      %18 = vector.shape_cast %17 : vector<1x10xf32> to vector<1x10xf32>
      %19 = vector.broadcast %18 : vector<1x10xf32> to vector<8x10xf32>
      %c0_11 = arith.constant 0 : index
      %c0_12 = arith.constant 0 : index
      %20 = vector.load %arg4[%c0_11, %c0_12] : memref<8x10xf32, #tpu.memory_space<vmem>>, vector<8x10xf32>
      tpu.vector_store %arg4[%c0_11, %c0_12], %19 {strides = array<i32>} : memref<8x10xf32, #tpu.memory_space<vmem>>, vector<8x10xf32>,
    } else {
    }
    %c0 = arith.constant 0 : index
    %c0_1 = arith.constant 0 : index
    %3 = vector.load %arg1[%c0, %c0_1] : memref<8x384xf32, #tpu.memory_space<vmem>>, vector<8x384xf32>
    %c384_i32 = arith.constant 384 : i32
    %4 = arith.muli %arg0, %c384_i32 : i32
    %5 = tpu.iota {dimensions = array<i32: 1>} : vector<8x384xi32>
    %6 = vector.broadcast %4 : i32 to vector<8x384xi32>
    %7 = arith.addi %6, %5 : vector<8x384xi32>
    %c300_i32 = arith.constant 300 : i32
    %8 = vector.broadcast %c300_i32 : i32 to vector<8x384xi32>
    %9 = arith.cmpi slt, %7, %8 : vector<8x384xi32>
    %cst = arith.constant 0.000000e+00 : f32
    %10 = vector.broadcast %cst : f32 to vector<8x384xf32>
    %11 = arith.select %9, %3, %10 : vector<8x384xi1>, vector<8x384xf32>
    %c0_2 = arith.constant 0 : index
    %c0_3 = arith.constant 0 : index
    %12 = vector.load %arg4[%c0_2, %c0_3] : memref<8x10xf32, #tpu.memory_space<vmem>>, vector<8x10xf32>
    %c0_4 = arith.constant 0 : index
    %c0_5 = arith.constant 0 : index
    %13 = vector.load %arg2[%c0_4, %c0_5] : memref<10x384xf32, #tpu.memory_space<vmem>>, vector<10x384xf32>
    %cst_6 = arith.constant dense<0.000000e+00> : vector<8x10xf32>
    %14 = tpu.matmul %11, %13, %cst_6 {dimension_numbers = #tpu.dot_dimension_numbers<[1], [1], [0], [0], [0, 0, 1, 0], [], []>} : vector<8x384xf32>, vector<10x384xf32>, vector<8x10xf32> -> vector<8x10xf32>
    %15 = arith.addf %12, %14 : vector<8x10xf32>
    %c0_7 = arith.constant 0 : index
    %c0_8 = arith.constant 0 : index
    %16 = vector.load %arg4[%c0_7, %c0_8] : memref<8x10xf32, #tpu.memory_space<vmem>>, vector<8x10xf32>
    tpu.vector_store %arg4[%c0_7, %c0_8], %15 {strides = array<i32>} : memref<8x10xf32, #tpu.memory_space<vmem>>, vector<8x10xf32>,
    return
  }
  func.func @transform_0(%arg0: i32) -> (i32, i32) {
    %c0_i32 = arith.constant 0 : i32
    %c0_i32_0 = arith.constant 0 : i32
    return %c0_i32, %arg0 : i32, i32
  }
  func.func @transform_1(%arg0: i32) -> (i32, i32) {
    %c0_i32 = arith.constant 0 : i32
    %c0_i32_0 = arith.constant 0 : i32
    return %c0_i32, %arg0 : i32, i32
  }
  func.func @transform_2(%arg0: i32) -> (i32, i32) {
    %c0_i32 = arith.constant 0 : i32
    %c0_i32_0 = arith.constant 0 : i32
    %c0_i32_1 = arith.constant 0 : i32
    return %c0_i32, %c0_i32_0 : i32, i32
  }
  func.func @transform_3(%arg0: i32) -> (i32, i32) {
    %c0_i32 = arith.constant 0 : i32
    %c0_i32_0 = arith.constant 0 : i32
    %c0_i32_1 = arith.constant 0 : i32
    return %c0_i32, %c0_i32_0 : i32, i32
  }
}

</mosaic_0001>

<bundles_post_ra>
// kernel: tpu_custom_call.1
= control target key start
LH: loop header
LB: loop body
LE: loop exit
PB: predicated region body
PF: predicated region fallthrough
CT: control target
= control target key end

     0   :  { %8 = vsyncpa [#allocation3], 0  ;;  %s283_s0 = inlined_call_operand.hbm [shape: f32[8,300], index: 0, kind: input, shape index: {}]   ;;  %s284_s1 = inlined_call_operand.hbm [shape: f32[10,384], index: 1, kind: input, shape index: {}]   ;;  %s285_s2 = inlined_call_operand.vmem [shape: f32[1,10], index: 2, kind: input, shape index: {}]   ;;  %s286_s3 = inlined_call_operand.hbm [shape: f32[8,10], index: 3, kind: output, shape index: {}]  }
   0x1   :  { %9 = vsyncpa [#allocation6], 0 }
   0x2   :  { %10 = vsyncpa [#allocation4], 0  ;;  %s16_s14 = sshll.u32 %s283_s0, 4  ;;  %s246_s15 = smov [#allocation2]   ;;  %s17_s14 = int_to_ptr.hbm [resolvable:$true] %s16_s14 }
   0x3   :  { %s18_s16 = sshll.u32 %s246_s15, 4  ;;  %s26_s19 = sshll.u32 %s284_s1, 4  ;;  %s19_s16 = int_to_ptr.vmem [resolvable:$true] %s18_s16  ;;  %s27_s19 = int_to_ptr.hbm [resolvable:$true] %s26_s19 }
   0x4   :  { %21 = dma.hbm_to_vmem [thread:$0]  %s17_s14, 384, %s19_s16, [#allocation3]  }
   0x5   :  { %s247_s20 = smov [#allocation5]   ;;  %s248_s22 = smov 384  }
   0x6   :  { %s28_s21 = sshll.u32 %s247_s20, 4  ;;  %s249_s23 = smov 24   ;;  %s29_s21 = int_to_ptr.vmem [resolvable:$true] %s28_s21 }
   0x7   :  { %34 = dma.hbm_to_vmem [thread:$0]  %s27_s19, 768, %s29_s21, [#allocation6], %s248_s22, %s248_s22, %s249_s23  }
   0x8   :  { %240 = dma.done.wait [#allocation3], 384  }
   0x9   :  { %241 = vsyncadd [#allocation3], 4294966912 }
   0xa   :  { %242 = dma.done.wait [#allocation6], 768  }
   0xb   :  { %243 = vsyncadd [#allocation6], 4294966528  ;;  %v59_v0 = vlaneseq  ;;  %v79_v2 = vld [vmem:[#allocation5 + $0x28] sm:$0x3]  ;;  %v77_v3 = vld [vmem:[#allocation5 + $0x18] sm:$0x3] }
   0xc   :  { %v78_v4 = vld [vmem:[#allocation5 + $0x20] sm:$0x3]  ;;  %134 = vmatpush.xpose.msra.mxu2 %v79_v2  ;;  %94 = vmatpush.xpose.msra.mxu0 %v77_v3  ;;  %v76_v6 = vld [vmem:[#allocation5 + $0x10] sm:$0xff]  ;;  %v75_v8 = vld [vmem:[#allocation5 + $0x8] sm:$0xff]  ;;  %vm53_vm1 = vcmask 80896   ;;  %s250_s24 = smov [#allocation7]  }
   0xd   :  { %v60_v1 = vand.u32 127, %v59_v0  ;;  %114 = vmatpush.xpose.msra.mxu1 %v78_v4  ;;  %v74_v7 = vld [vmem:[#allocation5] sm:$0xff]  ;;  %v57_v9 = vld [vmem:[#allocation2 + $0x10] sm:$0xff]  ;;  %v55_v10 = vld [vmem:[#allocation2] sm:$0xff]  ;;  %s148_s25 = sshll.u32 %s250_s24, 4  ;;  %s150_s28 = sshll.u32 %s286_s3, 4  ;;  %s149_s25 = int_to_ptr.vmem [resolvable:$true] %s148_s25  ;;  %s151_s28 = int_to_ptr.hbm [resolvable:$true] %s150_s28 }
   0xe   :  { %v56_v11 = vld [vmem:[#allocation2 + $0x8] sm:$0xff]  ;;  %v167_v12 = vld [vmem:[%s285_s2] ss:$0 sm:$0xff] }
   0xf   :  { %v62_v5 = vadd.s32 256, %v60_v1  ;;  %54 = vst.msk [vmem:[#allocation7] sm:$0xff] %vm53_vm1, %v167_v12 }
  0x10   :  { %135 = vmatpush.xpose.msra.mxu2 %v76_v6  ;;  %95 = vmatpush.xpose.msra.mxu0 %v74_v7 }
  0x11   :  { %vm69_vm0 = vcmp.lt.s32.totalorder %v62_v5, 300  ;;  %115 = vmatpush.xpose.msra.mxu1 %v75_v8 }
  0x13   :  { %161 = vmatmul.msk.f32.vlgmr.msra.gmra.mxu2 %vm69_vm0, %v57_v9  ;;  %96 = vmatmul.f32.vlgmr.msra.gmra.mxu0 %v55_v10 }
  0x14   :  { %116 = vmatmul.f32.vlgmr.msra.gmra.mxu1 %v56_v11 }
  0x16   :  { %v73_v16 = vld [vmem:[#allocation7] sm:$0xff] }
  0x90   :  { %v97_v13 = vpop.f32.mrf.mxu0 }
  0x91   :  { %v117_v14 = vpop.f32.mrf.mxu1 }
  0x92   :  { %v118_v15 = vadd.f32 %v117_v14, %v97_v13 }
  0x96   :  { %v137_v17 = vpop.f32.mrf.mxu2 }
  0x97   :  { %v138_v18 = vadd.f32 %v137_v17, %v118_v15 }
  0x99   :  { %v140_v19 = vadd.f32 %v138_v18, %v73_v16 }
  0x9b   :  { %142 = vst.msk [vmem:[#allocation7] sm:$0xff] %vm53_vm1, %v140_v19 }
  0x9c   :  { %153 = dma.vmem_to_hbm [thread:$0]  %s149_s25, 128, %s151_s28, [#allocation4]  }
  0x9d   :  { %244 = dma.done.wait [#allocation4], 128  }
  0x9e   :  { %245 = vsyncadd [#allocation4], 4294967168 }
  0x9f   :  { %158 = vsyncpa [#allocation3], 1 }
  0xa0   :  { %159 = vsyncpa [#allocation6], 1 }
  0xa1   :  { %160 = vsyncpa [#allocation4], 1 }

</bundles_post_ra>
